<compile_context>
chip_gen: v7x
topology: tpu7x:2x2x1
jax: 0.10.0
libtpu: 0.0.40
codegen_flags: <defaults>
</compile_context>

<pallas_src>
import math

import jax
import jax.numpy as jnp
from jax.experimental import pallas as pl
from jax.experimental.pallas import tpu as pltpu


def _round_up(v, m):
    return (v + m - 1) // m * m


def _pick_tk(K, cap):
    """Largest K-tile <= cap that avoids padding: tk == K, or a divisor of K
    that is a multiple of 128.  Falls back to a plain multiple of 128 (the
    wrapper then zero-pads K, which is correctness-preserving)."""
    cap = max(int(cap), 128)
    if K <= cap:
        return K                       # single K step, no padding
    best = 0
    if K % 128 == 0:
        base = K // 128
        d = 1
        while d * d <= base:
            if base % d == 0:
                for q in (d, base // d):
                    tk = 128 * q
                    if tk <= cap and tk > best:
                        best = tk
            d += 1
    if best >= 128:
        return best
    return (cap // 128) * 128          # fallback: wrapper pads K


def decoder_fc_kernel(x_ref, w_ref, b_ref, o_ref, acc_ref):
    k = pl.program_id(1)

    @pl.when(k == 0)
    def _():
        acc_ref[...] = jnp.zeros_like(acc_ref)

    # (bm, tk) . (N, tk), contracting the K (lane) axis of both -> (bm, N),
    # accumulated in f32 on the MXU.
    acc_ref[...] += jax.lax.dot_general(
        x_ref[...], w_ref[...],
        dimension_numbers=(((1,), (1,)), ((), ())),
        preferred_element_type=jnp.float32,
    )

    @pl.when(k == pl.num_programs(1) - 1)
    def _():
        # Bias applied exactly once, then numerically-stable softmax over dim 1.
        logits = acc_ref[...] + b_ref[...]
        m = jnp.max(logits, axis=-1, keepdims=True)
        e = jnp.exp(logits - m)
        denom = jnp.sum(e, axis=-1, keepdims=True)
        o_ref[...] = (e / denom).astype(o_ref.dtype)   # exact divide: rows sum to 1


def decoder_fc(x, weight, bias, *, bm=None, tk=None,
               vmem_limit_bytes=None, stream_dtype=None):
    """x: (B, ...) flattened to (B, K); weight: (N, K) torch layout; bias: (N,).

    stream_dtype: optionally cast x/weight to e.g. jnp.bfloat16 for streaming;
    accumulation and the softmax stay in f32.
    """
    if x.ndim > 2:
        x = x.reshape(x.shape[0], -1)            # torch.flatten(x, 1)
    B, K = x.shape
    N, Kw = weight.shape
    assert Kw == K, (Kw, K)

    if stream_dtype is not None:
        x = x.astype(stream_dtype)
        weight = weight.astype(stream_dtype)
    itemsize = jnp.dtype(x.dtype).itemsize

    # Generation-aware VMEM budget: ~96 MiB on 128 MiB parts (v5e/v6e),
    # ~48 MiB on 64 MiB parts (v7x).
    if vmem_limit_bytes is None:
        phys = 128 * 1024 * 1024
        try:
            phys = int(pltpu.get_tpu_info().vmem_capacity_bytes)
        except Exception:
            pass
        vmem_limit_bytes = int(min(96 * 1024 * 1024, phys - 16 * 1024 * 1024))
    vmem_limit_bytes = int(vmem_limit_bytes)

    # Batch tile.  For B <= 128 take the whole batch as one block (legal even
    # when B is not a multiple of 8, because the block dim equals the full array
    # dim) -> no batch padding and the weight is streamed exactly once.
    if bm is None:
        bm = B if B <= 128 else 128
    if B <= bm:
        bm, B_pad = B, B
    else:
        bm = _round_up(min(bm, 128), 8)
        B_pad = _round_up(B, bm)

    # K tile: sized so the double-buffered 2*(bm+N)*tk*itemsize working set fits
    # the scoped-VMEM budget, preferring an exact divisor of K (no weight pad).
    if tk is None:
        headroom = 2 * 1024 * 1024
        per_col = 2 * (bm + N) * itemsize
        tk = _pick_tk(K, (vmem_limit_bytes - headroom) // per_col)
    if tk >= K:
        tk, K_pad = K, K
    elif K % tk == 0 and tk % 128 == 0:
        K_pad = K
    else:
        tk = _round_up(tk, 128)
        K_pad = _round_up(K, tk)

    # Zero-padding only on fallback paths (zero K-padding contributes nothing
    # to the dot; padded batch rows are sliced off below).
    if (B_pad, K_pad) != (B, K):
        x = jnp.pad(x, ((0, B_pad - B), (0, K_pad - K)))
    if K_pad != K:
        weight = jnp.pad(weight, ((0, 0), (0, K_pad - K)))

    b2d = bias.reshape(1, N).astype(jnp.float32)

    grid = (B_pad // bm, K_pad // tk)

    out = pl.pallas_call(
        decoder_fc_kernel,
        out_shape=jax.ShapeDtypeStruct((B_pad, N), jnp.float32),
        grid_spec=pltpu.PrefetchScalarGridSpec(
            num_scalar_prefetch=0,
            grid=grid,
            in_specs=[
                pl.BlockSpec((bm, tk), lambda i, k: (i, k)),   # activations (B, K)
                pl.BlockSpec((N, tk), lambda i, k: (0, k)),    # weight, torch (N, K)
                pl.BlockSpec((1, N), lambda i, k: (0, 0)),     # bias (tiny)
            ],
            out_specs=pl.BlockSpec((bm, N), lambda i, k: (i, 0)),
            scratch_shapes=[pltpu.VMEM((bm, N), jnp.float32)],
        ),
        compiler_params=pltpu.CompilerParams(
            dimension_semantics=("parallel", "arbitrary"),
            vmem_limit_bytes=vmem_limit_bytes,
        ),
    )(x, weight, b2d)
    return out[:B]


if __name__ == "__main__":
    # Small, module-consistent shapes: NCHW input (2, 4, 16, 16) flattens to
    # (2, 1024).  The real module uses in_features = 230400; we shrink it for
    # this synthetic example while keeping identical semantics.
    B, C, H, W = 2, 4, 16, 16
    K = C * H * W                    # in_features of fc2
    n_output = 8                     # len(config['selected_opensim_labels'])

    key = jax.random.PRNGKey(0)
    kx, kw, kb = jax.random.split(key, 3)

    x = jax.random.normal(kx, (B, C, H, W), dtype=jnp.float32)

    # Deterministic PyTorch-style Linear init: U(-1/sqrt(K), 1/sqrt(K)).
    bound = 1.0 / math.sqrt(K)
    weight = jax.random.uniform(kw, (n_output, K), dtype=jnp.float32,
                                minval=-bound, maxval=bound)
    bias = jax.random.uniform(kb, (n_output,), dtype=jnp.float32,
                              minval=-bound, maxval=bound)

    # Reference in plain JAX.
    x_flat = x.reshape(B, -1)
    ref = jax.nn.softmax(x_flat @ weight.T + bias, axis=-1)

    # 1) Default tiling: tk == K here -> single K step, zero padding anywhere.
    out_single = jax.block_until_ready(decoder_fc(x, weight, bias))
    # 2) Forced multi-step K reduction (tk divides K -> still no padding).
    out_multi = jax.block_until_ready(decoder_fc(x, weight, bias, tk=256))

    for out in (out_single, out_multi):
        assert out.shape == (B, n_output)
        assert jnp.allclose(out, ref, atol=2e-3, rtol=2e-3)
        assert jnp.allclose(jnp.sum(out, axis=-1), 1.0, atol=1e-3)

    # 3) bf16 operand streaming (f32 accumulation) — looser tolerance.
    out_bf16 = jax.block_until_ready(
        decoder_fc(x, weight, bias, stream_dtype=jnp.bfloat16))
    assert out_bf16.shape == (B, n_output)
    assert jnp.allclose(out_bf16, ref, atol=3e-2, rtol=3e-2)
    assert jnp.allclose(jnp.sum(out_bf16, axis=-1), 1.0, atol=1e-3)

    print("KERNEL_OK")
</pallas_src>

<mosaic_0001>
module attributes {stable_mosaic.version = 11 : i64} {
  func.func @decoder_fc_kernel(%arg0: i32, %arg1: i32, %arg2: memref<2x1024xf32, #tpu.memory_space<vmem>>, %arg3: memref<8x1024xf32, #tpu.memory_space<vmem>>, %arg4: memref<1x8xf32, #tpu.memory_space<vmem>>, %arg5: memref<2x8xf32, #tpu.memory_space<vmem>>, %arg6: memref<2x8xf32, #tpu.memory_space<vmem>>) attributes {dimension_semantics = [#tpu.dimension_semantics<parallel>, #tpu.dimension_semantics<arbitrary>], iteration_bounds = array<i64: 1, 1>, scalar_prefetch = 0 : i64, scratch_operands = 1 : i64, tpu.core_type = #tpu.core_type<tc>, window_params = [{transform_indices = @transform_0, window_bounds = array<i64: 2, 1024>}, {transform_indices = @transform_1, window_bounds = array<i64: 8, 1024>}, {pipeline_mode = #tpu.pipeline_mode<synchronous>, transform_indices = @transform_2, window_bounds = array<i64: 1, 8>}, {transform_indices = @transform_3, window_bounds = array<i64: 2, 8>}]} {
    %c0_i32 = arith.constant 0 : i32
    %0 = arith.cmpi eq, %arg1, %c0_i32 : i32
    %1 = arith.extui %0 : i1 to i32
    %c0_i32_0 = arith.constant 0 : i32
    %2 = arith.cmpi ne, %1, %c0_i32_0 : i32
    scf.if %2 {
      %cst_10 = arith.constant 0.000000e+00 : f32
      %12 = vector.broadcast %cst_10 : f32 to vector<2x8xf32>
      %c0_11 = arith.constant 0 : index
      %c0_12 = arith.constant 0 : index
      %13 = vector.load %arg6[%c0_11, %c0_12] : memref<2x8xf32, #tpu.memory_space<vmem>>, vector<2x8xf32>
      tpu.vector_store %arg6[%c0_11, %c0_12], %12 {strides = array<i32>} : memref<2x8xf32, #tpu.memory_space<vmem>>, vector<2x8xf32>,
    } else {
    }
    %c0 = arith.constant 0 : index
    %c0_1 = arith.constant 0 : index
    %3 = vector.load %arg6[%c0, %c0_1] : memref<2x8xf32, #tpu.memory_space<vmem>>, vector<2x8xf32>
    %c0_2 = arith.constant 0 : index
    %c0_3 = arith.constant 0 : index
    %4 = vector.load %arg2[%c0_2, %c0_3] : memref<2x1024xf32, #tpu.memory_space<vmem>>, vector<2x1024xf32>
    %c0_4 = arith.constant 0 : index
    %c0_5 = arith.constant 0 : index
    %5 = vector.load %arg3[%c0_4, %c0_5] : memref<8x1024xf32, #tpu.memory_space<vmem>>, vector<8x1024xf32>
    %cst = arith.constant dense<0.000000e+00> : vector<2x8xf32>
    %6 = tpu.matmul %4, %5, %cst {dimension_numbers = #tpu.dot_dimension_numbers<[1], [1], [0], [0], [0, 0, 1, 0], [], []>} : vector<2x1024xf32>, vector<8x1024xf32>, vector<2x8xf32> -> vector<2x8xf32>
    %7 = arith.addf %3, %6 : vector<2x8xf32>
    %c0_6 = arith.constant 0 : index
    %c0_7 = arith.constant 0 : index
    %8 = vector.load %arg6[%c0_6, %c0_7] : memref<2x8xf32, #tpu.memory_space<vmem>>, vector<2x8xf32>
    tpu.vector_store %arg6[%c0_6, %c0_7], %7 {strides = array<i32>} : memref<2x8xf32, #tpu.memory_space<vmem>>, vector<2x8xf32>,
    %c0_i32_8 = arith.constant 0 : i32
    %9 = arith.cmpi eq, %arg1, %c0_i32_8 : i32
    %10 = arith.extui %9 : i1 to i32
    %c0_i32_9 = arith.constant 0 : i32
    %11 = arith.cmpi ne, %10, %c0_i32_9 : i32
    scf.if %11 {
      %c0_10 = arith.constant 0 : index
      %c0_11 = arith.constant 0 : index
      %12 = vector.load %arg6[%c0_10, %c0_11] : memref<2x8xf32, #tpu.memory_space<vmem>>, vector<2x8xf32>
      %c0_12 = arith.constant 0 : index
      %c0_13 = arith.constant 0 : index
      %13 = vector.load %arg4[%c0_12, %c0_13] : memref<1x8xf32, #tpu.memory_space<vmem>>, vector<1x8xf32>
      %14 = vector.broadcast %13 : vector<1x8xf32> to vector<2x8xf32>
      %15 = arith.addf %12, %14 : vector<2x8xf32>
      %cst_14 = arith.constant dense<0xFF800000> : vector<2xf32>
      %16 = vector.multi_reduction <maximumf>, %15, %cst_14 [1] : vector<2x8xf32> to vector<2xf32>
      %17 = vector.shape_cast %16 : vector<2xf32> to vector<2x1xf32>
      %18 = vector.broadcast %17 : vector<2x1xf32> to vector<2x8xf32>
      %19 = arith.subf %15, %18 : vector<2x8xf32>
      %20 = math.exp %19 : vector<2x8xf32>
      %cst_15 = arith.constant dense<0.000000e+00> : vector<2xf32>
      %21 = vector.multi_reduction <add>, %20, %cst_15 [1] : vector<2x8xf32> to vector<2xf32>
      %22 = vector.shape_cast %21 : vector<2xf32> to vector<2x1xf32>
      %23 = vector.broadcast %22 : vector<2x1xf32> to vector<2x8xf32>
      %24 = arith.divf %20, %23 : vector<2x8xf32>
      %c0_16 = arith.constant 0 : index
      %c0_17 = arith.constant 0 : index
      %25 = vector.load %arg5[%c0_16, %c0_17] : memref<2x8xf32, #tpu.memory_space<vmem>>, vector<2x8xf32>
      tpu.vector_store %arg5[%c0_16, %c0_17], %24 {strides = array<i32>} : memref<2x8xf32, #tpu.memory_space<vmem>>, vector<2x8xf32>,
    } else {
    }
    return
  }
  func.func @transform_0(%arg0: i32, %arg1: i32) -> (i32, i32) {
    %c0_i32 = arith.constant 0 : i32
    return %arg0, %arg1 : i32, i32
  }
  func.func @transform_1(%arg0: i32, %arg1: i32) -> (i32, i32) {
    %c0_i32 = arith.constant 0 : i32
    %c0_i32_0 = arith.constant 0 : i32
    return %c0_i32, %arg1 : i32, i32
  }
  func.func @transform_2(%arg0: i32, %arg1: i32) -> (i32, i32) {
    %c0_i32 = arith.constant 0 : i32
    %c0_i32_0 = arith.constant 0 : i32
    %c0_i32_1 = arith.constant 0 : i32
    return %c0_i32, %c0_i32_0 : i32, i32
  }
  func.func @transform_3(%arg0: i32, %arg1: i32) -> (i32, i32) {
    %c0_i32 = arith.constant 0 : i32
    %c0_i32_0 = arith.constant 0 : i32
    return %arg0, %c0_i32 : i32, i32
  }
}

</mosaic_0001>

<bundles_post_ra>
// kernel: tpu_custom_call.1
= control target key start
LH: loop header
LB: loop body
LE: loop exit
PB: predicated region body
PF: predicated region fallthrough
CT: control target
= control target key end

     0   :  { %8 = vsyncpa [#allocation4], 0  ;;  %s620_s0 = inlined_call_operand.hbm [shape: f32[2,1024], index: 0, kind: input, shape index: {}]   ;;  %s621_s1 = inlined_call_operand.hbm [shape: f32[8,1024], index: 1, kind: input, shape index: {}]   ;;  %s622_s2 = inlined_call_operand.hbm [shape: f32[1,8], index: 2, kind: input, shape index: {}]   ;;  %s623_s3 = inlined_call_operand.hbm [shape: f32[2,8], index: 3, kind: output, shape index: {}]  }
   0x1   :  { %9 = vsyncpa [#allocation7], 0 }
   0x2   :  { %10 = vsyncpa [#allocation5], 0  ;;  %s541_s12 = smov [#allocation6]   ;;  %s542_s14 = smov [#allocation3]  }
   0x3   :  { %s27_s13 = sshll.u32 %s541_s12, 4  ;;  %s17_s15 = sshll.u32 %s542_s14, 4  ;;  %s28_s13 = int_to_ptr.vmem [resolvable:$true] %s27_s13  ;;  %s18_s15 = int_to_ptr.vmem [resolvable:$true] %s17_s15 }
   0x4   :  { %s447_s18 = scalar_lea.hbm %s621_s1, 1024 }
   0x5   :  { %p448_p0 = scmp.ne.s32.totalorder %s621_s1, %s447_s18  ;;  %p451_p1 = scmp.lt.u32.totalorder %s447_s18, %s621_s1 }
   0x7   :  { %p453_p2 = pnand %p451_p1, %p448_p0 }
   0x9   :  { %456 = shalt.err (!%p453_p2)
}
   0xa   :  { %s457_s23 = scalar_lea.vmem %s28_s13, 1024  ;;  %p462_p4 = scmp.lt.s32.totalorder %s28_s13, %s28_s13 }
   0xb   :  { %p458_p3 = scmp.ne.s32.totalorder %s28_s13, %s457_s23  ;;  %p463_p5 = scmp.lt.s32.totalorder %s457_s23, %s457_s23 }
   0xd   :  { %p464_p6 = por %p463_p5, %p462_p4 }
   0xf   :  { %p465_p7 = pnand %p464_p6, %p458_p3 }
  0x11   :  { %468 = shalt.err (!%p465_p7)
}
  0x12   :  { %30 = dma.hbm_to_vmem [thread:$0]  %s621_s1, 1024, %s28_s13, [#allocation7]  }
  0x13   :  { %s469_s28 = scalar_lea.hbm %s620_s0, 256 }
  0x14   :  { %p470_p8 = scmp.ne.s32.totalorder %s620_s0, %s469_s28  ;;  %p473_p9 = scmp.lt.u32.totalorder %s469_s28, %s620_s0 }
  0x16   :  { %p475_p10 = pnand %p473_p9, %p470_p8 }
  0x18   :  { %478 = shalt.err (!%p475_p10)
}
  0x19   :  { %s479_s6 = scalar_lea.vmem %s18_s15, 256  ;;  %p484_p12 = scmp.lt.s32.totalorder %s18_s15, %s18_s15 }
  0x1a   :  { %p480_p11 = scmp.ne.s32.totalorder %s18_s15, %s479_s6  ;;  %p485_p13 = scmp.lt.s32.totalorder %s479_s6, %s479_s6 }
  0x1c   :  { %p486_p0 = por %p485_p13, %p484_p12 }
  0x1e   :  { %p487_p1 = pnand %p486_p0, %p480_p11 }
  0x20   :  { %490 = shalt.err (!%p487_p1)
}
  0x21   :  { %20 = dma.hbm_to_vmem [thread:$0]  %s620_s0, 256, %s18_s15, [#allocation4]  }
  0x22   :  { %s543_s8 = smov [#allocation8]   ;;  %s491_s12 = scalar_lea.hbm %s622_s2, 16 }
  0x23   :  { %s37_s9 = sshll.u32 %s543_s8, 4  ;;  %p492_p2 = scmp.ne.s32.totalorder %s622_s2, %s491_s12  ;;  %s38_s9 = int_to_ptr.vmem [resolvable:$true] %s37_s9 }
  0x24   :  { %p495_p3 = scmp.lt.u32.totalorder %s491_s12, %s622_s2 }
  0x26   :  { %p497_p4 = pnand %p495_p3, %p492_p2 }
  0x28   :  { %500 = shalt.err (!%p497_p4)
}
  0x29   :  { %s501_s18 = scalar_lea.vmem %s38_s9, 16  ;;  %s505_s0 = scalar_lea.vmem %s38_s9, 32 }
  0x2a   :  { %p502_p5 = scmp.ne.s32.totalorder %s38_s9, %s501_s18  ;;  %p506_p6 = scmp.lt.s32.totalorder %s38_s9, %s38_s9 }
  0x2b   :  { %p507_p7 = scmp.lt.s32.totalorder %s505_s0, %s501_s18 }
  0x2d   :  { %p508_p8 = por %p507_p7, %p506_p6 }
  0x2f   :  { %p509_p9 = pnand %p508_p8, %p502_p5 }
  0x31   :  { %512 = shalt.err (!%p509_p9)
}
  0x32   :  { %40 = dma.hbm_to_vmem [thread:$0]  %s622_s2, 16, %s38_s9, [#allocation7]  }
  0x33   :  { %535 = dma.done.wait [#allocation4], 256  }
  0x34   :  { %536 = vsyncadd [#allocation4], 4294967040 }
  0x35   :  { %537 = dma.done.wait [#allocation7], 1040  }
  0x36   :  { %538 = vsyncadd [#allocation7], 4294966256  ;;  %v73_v0 = vlaneseq  ;;  %v544_v1 = vmov 1983009808   ;;  %v60_v6 = vld [vmem:[#allocation6 + $0x8] sm:$0xff]  ;;  %v59_v7 = vld [vmem:[#allocation6] sm:$0xff] }
  0x37   :  { %v71_v2 = vunpack.c.l.s4 %v544_v1  ;;  %v62_v8 = vld [vmem:[#allocation6 + $0x18] sm:$0xff]  ;;  %111 = vmatprep.subr.mxu0 %v60_v6  ;;  %v61_v9 = vld [vmem:[#allocation6 + $0x10] sm:$0xff]  ;;  %v64_v11 = vld [vmem:[#allocation6 + $0x28] sm:$0xff]  ;;  %vm54_vm0 = vcmask 58368   ;;  %v545_v26 = vmov 0.0   ;;  %s546_s2 = smov [#allocation9]  }
  0x38   :  { %v74_v3 = vshrl.u32 %v73_v0, 7  ;;  %181 = vmatprep.subr.mxu1 %v62_v8  ;;  %v57_v10 = vld [vmem:[#allocation3] sm:$0xff]  ;;  %112 = vmatpush1.xpose.msra.mxu0 %v59_v7  ;;  %v66_v14 = vld [vmem:[#allocation6 + $0x38] sm:$0xff]  ;;  %v63_v20 = vld [vmem:[#allocation6 + $0x20] sm:$0xff]  ;;  %55 = vst.msk [vmem:[#allocation2] sm:$0x3] %vm54_vm0, %v545_v26 }
  0x39   :  { %v72_v4 = vunpack.c.0.s8 %v71_v2  ;;  %182 = vmatpush1.xpose.msra.mxu1 %v61_v9  ;;  %v69_v13 = vcombine.high %v57_v10, %v57_v10  ;;  %251 = vmatprep.subr.mxu0 %v64_v11  ;;  %v58_v15 = vld [vmem:[#allocation3 + $0x8] sm:$0xff]  ;;  %v65_v24 = vld [vmem:[#allocation6 + $0x30] sm:$0xff]  ;;  %v434_v40 = vld [vmem:[#allocation8] ss:$0 sm:$0xff]  ;;  %s424_s20 = sshll.u32 %s546_s2, 4  ;;  %s425_s20 = int_to_ptr.vmem [resolvable:$true] %s424_s20 }
  0x3a   :  { %321 = vmatprep.subr.mxu1 %v66_v14  ;;  %v86_v19 = vcombine.high %v58_v15, %v58_v15  ;;  %s513_s21 = scalar_lea.vmem %s425_s20, 32  ;;  %p518_p11 = scmp.lt.s32.totalorder %s425_s20, %s425_s20 }
  0x3b   :  { %v75_v5 = vsub.s32 %v72_v4, %v74_v3  ;;  %p514_p10 = scmp.ne.s32.totalorder %s425_s20, %s513_s21  ;;  %p519_p12 = scmp.lt.s32.totalorder %s513_s21, %s513_s21 }
  0x3d   :  { %v76_v12 = vrot.slane %v57_v10, %v75_v5  ;;  %v83_v17 = vrot.slane %v69_v13, %v75_v5  ;;  %v93_v18 = vrot.slane %v58_v15, %v75_v5  ;;  %v100_v23 = vrot.slane %v86_v19, %v75_v5  ;;  %p520_p13 = por %p519_p12, %p518_p11 }
  0x3f   :  { %v84_v16 = vcombine.high %v76_v12, %v76_v12  ;;  %v85_v21 = vcombine.high %v83_v17, %v83_v17  ;;  %v101_v22 = vcombine.high %v93_v18, %v93_v18  ;;  %v102_v25 = vcombine.high %v100_v23, %v100_v23  ;;  %v56_v35 = vld [vmem:[#allocation2] sm:$0x3]  ;;  %p521_p0 = pnand %p520_p13, %p514_p10 }
  0x41   :  { %175 = vmatprep.mubr.f32.mxu0 %v84_v16  ;;  %245 = vmatprep.mubr.f32.mxu1 %v85_v21 }
  0x42   :  { %176 = vmatmul.mubr.f32.vlgmr.msra.gmra.mrb[0].mxu0 %v76_v12  ;;  %246 = vmatmul.mubr.f32.vlgmr.msra.gmra.mrb[0].mxu1 %v83_v17 }
  0x43   :  { %252 = vmatpush1.xpose.msra.mxu0 %v63_v20  ;;  %315 = vmatprep.mubr.f32.mxu0 %v101_v22 }
  0x44   :  { %322 = vmatpush1.xpose.msra.mxu1 %v65_v24  ;;  %385 = vmatprep.mubr.f32.mxu1 %v102_v25 }
  0x46   :  { %316 = vmatmul.mubr.f32.vlgmr.msra.gmra.mrb[2].mxu0 %v93_v18 }
  0x47   :  { %386 = vmatmul.mubr.f32.vlgmr.msra.gmra.mrb[2].mxu1 %v100_v23 }
 0x115   :  { %v177_v27 = vpop.f32.mrb[0].mxu0  ;;  %v247_v29 = vpop.f32.mrb[0].mxu1 }
 0x116   :  { %v179_v28 = vpop.f32.mrb[1].mxu0  ;;  %v248_v30 = vadd.f32 %v247_v29, %v177_v27  ;;  %v249_v31 = vpop.f32.mrb[1].mxu1 }
 0x119   :  { %v317_v32 = vpop.f32.mrb[2].mxu0 }
 0x11a   :  { %v318_v33 = vadd.f32 %v317_v32, %v248_v30  ;;  %v319_v34 = vpop.f32.mrb[3].mxu0  ;;  %v387_v36 = vpop.f32.mrb[2].mxu1 }
 0x11b   :  { %v389_v38 = vpop.f32.mrb[3].mxu1 }
 0x11c   :  { %v388_v37 = vadd.f32 %v387_v36, %v318_v33 }
 0x11e   :  { %v391_v39 = vadd.f32 %v388_v37, %v56_v35 }
 0x120   :  { %393 = vst.msk [vmem:[#allocation2] sm:$0x3] %vm54_vm0, %v391_v39 }
 0x127   :  { %v397_v41 = vld [vmem:[#allocation2] sm:$0x3] }
 0x128   :  { %v405_v42 = vadd.f32 %v434_v40, %v397_v41 }
 0x12a   :  { %v406_v43 = vsel %vm54_vm0, %v405_v42, -inf }
 0x12b   :  { %407 = vmax.xlane.f32.xlu0 %v406_v43 }
 0x1b8   :  { %v408_v44 = vpop.xlane.xlu0 %407 }
 0x1b9   :  { %v409_v45 = vsub.f32 %v405_v42, %v408_v44 }
 0x1bb   :  { %v410_v46 = vmul.f32 1.442695, %v409_v45 }
 0x1bd   :  { %443 = vpow2.f32 %v410_v46 }
 0x1c7   :  { %v444_v47 = vpop.eup %443 }
 0x1c8   :  { %v412_v48 = vsel %vm54_vm0, %v444_v47, 0.0 }
 0x1c9   :  { %413 = vadd.xlane.f32.xlu0 %v412_v48 }
 0x256   :  { %v414_v49 = vpop.xlane.xlu0 %413 }
 0x257   :  { %445 = vrcp.f32 %v414_v49 }
 0x261   :  { %v446_v50 = vpop.eup %445 }
 0x262   :  { %v416_v51 = vmul.f32 %v446_v50, %v444_v47 }
 0x264   :  { %417 = vst.msk [vmem:[#allocation9] sm:$0x3] %vm54_vm0, %v416_v51 }
 0x265   :  { %524 = shalt.err (!%p521_p0)
}
 0x266   :  { %s525_s24 = scalar_lea.hbm %s623_s3, 32 }
 0x267   :  { %p526_p1 = scmp.ne.s32.totalorder %s623_s3, %s525_s24  ;;  %p529_p2 = scmp.lt.u32.totalorder %s525_s24, %s623_s3 }
 0x269   :  { %p531_p3 = pnand %p529_p2, %p526_p1 }
 0x26b   :  { %534 = shalt.err (!%p531_p3)
}
 0x26c   :  { %427 = dma.vmem_to_hbm [thread:$0]  %s425_s20, 32, %s623_s3, [#allocation5]  }
 0x26d   :  { %539 = dma.done.wait [#allocation5], 32  }
 0x26e   :  { %540 = vsyncadd [#allocation5], 4294967264 }
 0x26f   :  { %431 = vsyncpa [#allocation4], 1 }
 0x270   :  { %432 = vsyncpa [#allocation7], 1 }
 0x271   :  { %433 = vsyncpa [#allocation5], 1 }

</bundles_post_ra>
